<compile_context>
chip_gen: v7x
topology: tpu7x:2x2x1
jax: 0.10.0
libtpu: 0.0.40
codegen_flags: <defaults>
</compile_context>

<pallas_src>
import functools

import jax
import jax.numpy as jnp
from jax.experimental import pallas as pl
from jax.experimental.pallas import tpu as pltpu

NEG_INF = -1e30


# ---------------------------------------------------------------------------
# Stage 1: fused projection + per-head attention scores, tiled over node rows.
# ---------------------------------------------------------------------------
def _proj_kernel(feats_ref, w_ref, alt_ref, ar_ref,
                 ft_ref, res_ref, elt_ref, er_ref, *, hd):
    # One fused MXU pass for [W_fc | W_res] (bf16 in, f32 accumulate).
    proj = jnp.dot(feats_ref[...], w_ref[...],
                   preferred_element_type=jnp.float32)            # (TM, 2*HD)
    ft = proj[:, :hd]                                             # (TM, HD) f32
    ft_ref[...] = ft.astype(jnp.bfloat16)                         # stage-2 MXU operand
    res_ref[...] = proj[:, hd:]                                   # residual, f32

    # All-head scores in one shot (hoisted out of stage 2).  el is produced
    # directly in (H, TM) layout (src scores live along lanes in stage 2), so
    # no per-head transposes are ever needed anywhere.
    elt_ref[...] = jax.lax.dot_general(                           # (HP, TM)
        alt_ref[...], ft, (((1,), (1,)), ((), ())),
        preferred_element_type=jnp.float32)
    er_ref[...] = jnp.dot(ft, ar_ref[...],                        # (TM, HP)
                          preferred_element_type=jnp.float32)


# ---------------------------------------------------------------------------
# Stage 2: masked edge softmax + message passing, tiled over dst-node rows.
# ---------------------------------------------------------------------------
def _attn_kernel(adj_ref, elt_ref, er_ref, ft_ref, res_ref, out_ref,
                 *, num_heads, out_feats, alpha):
    # adj[dst, src] for this dst tile (int8) -> single additive mask, hoisted
    # over heads.  NOTE: an isolated dst row (no incoming edges) yields uniform
    # 1/N weights here instead of the NaN the dense reference produces; the
    # demo graph has no isolated nodes.
    adjf = adj_ref[...].astype(jnp.float32)                       # (TM, N)
    neg_mask = jnp.where(adjf > 0.0, 0.0, NEG_INF)                # (TM, N)
    elt = elt_ref[...]                                            # (HP, N)  f32
    er = er_ref[...]                                              # (TM, HP) f32

    for h in range(num_heads):                                    # small static unroll
        # e[dst, src] = LeakyReLU(el[src] + er[dst]), then mask non-edges.
        e = er[:, h:h + 1] + elt[h:h + 1, :]                      # (TM, N)
        e = jnp.maximum(e, alpha * e)                             # LeakyReLU
        e = e + neg_mask

        # Edge softmax over incoming edges of each dst row (f32 math).
        m = jnp.max(e, axis=1, keepdims=True)                     # (TM, 1)
        p = jnp.exp(e - m)                                        # non-edges -> 0
        inv = pl.reciprocal(jnp.sum(p, axis=1, keepdims=True), approx=True)
        a = (p * inv).astype(jnp.bfloat16)                        # (TM, N) bf16

        # Message passing on the MXU (bf16 x bf16 -> f32) + residual, written
        # straight into the per-head output slice (no concatenate).
        sl = slice(h * out_feats, (h + 1) * out_feats)
        out_ref[:, sl] = (jnp.dot(a, ft_ref[:, sl],
                                  preferred_element_type=jnp.float32)
                          + res_ref[:, sl])


# ---------------------------------------------------------------------------
# Wrapper
# ---------------------------------------------------------------------------
def gat_layer(feats, adj, w_fc, attn_l, attn_r, w_res, *,
              num_heads, out_feats, alpha=0.2, tile_m=128):
    n, din = feats.shape
    hd = num_heads * out_feats
    tile_m = min(tile_m, n)
    assert n % tile_m == 0, "N must be a multiple of tile_m"
    hp = ((max(num_heads, 8) + 7) // 8) * 8      # pad head axis to >=8 sublanes

    # --- host-side packing -------------------------------------------------
    feats_bf = feats.astype(jnp.bfloat16)
    w_cat = jnp.concatenate([w_fc, w_res], axis=1).astype(jnp.bfloat16)  # (Din, 2HD)
    eye = jnp.eye(num_heads, dtype=jnp.float32)
    # a_lt[h, h*Dout + d] = attn_l[h, d]   (block "diagonal" row layout)
    a_lt = (eye[:, :, None] * attn_l[None, :, :]).reshape(num_heads, hd)
    a_lt = jnp.zeros((hp, hd), jnp.float32).at[:num_heads].set(a_lt)
    # a_r[h*Dout + d, j] = attn_r[h, d] * (h == j)
    a_r = (attn_r[:, :, None] * eye[:, None, :]).reshape(hd, num_heads)
    a_r = jnp.zeros((hd, hp), jnp.float32).at[:, :num_heads].set(a_r)
    adj_i8 = (adj != 0).astype(jnp.int8)

    cparams = pltpu.CompilerParams(
        dimension_semantics=("parallel",),
        vmem_limit_bytes=48 * 1024 * 1024)

    # --- stage 1: projection + scores (row tiles) ---------------------------
    ft_bf, res, elt, er = pl.pallas_call(
        functools.partial(_proj_kernel, hd=hd),
        grid=(n // tile_m,),
        in_specs=[
            pl.BlockSpec((tile_m, din), lambda i: (i, 0)),
            pl.BlockSpec((din, 2 * hd), lambda i: (0, 0)),
            pl.BlockSpec((hp, hd), lambda i: (0, 0)),
            pl.BlockSpec((hd, hp), lambda i: (0, 0)),
        ],
        out_specs=[
            pl.BlockSpec((tile_m, hd), lambda i: (i, 0)),
            pl.BlockSpec((tile_m, hd), lambda i: (i, 0)),
            pl.BlockSpec((hp, tile_m), lambda i: (0, i)),
            pl.BlockSpec((tile_m, hp), lambda i: (i, 0)),
        ],
        out_shape=[
            jax.ShapeDtypeStruct((n, hd), jnp.bfloat16),   # ft (bf16 operand)
            jax.ShapeDtypeStruct((n, hd), jnp.float32),    # residual
            jax.ShapeDtypeStruct((hp, n), jnp.float32),    # el, pre-transposed
            jax.ShapeDtypeStruct((n, hp), jnp.float32),    # er
        ],
        compiler_params=cparams,
    )(feats_bf, w_cat, a_lt, a_r)

    # --- stage 2: attention + aggregation over dst-row tiles ----------------
    # TODO(synk): for very large N, add a second src-block grid axis with an
    # online-softmax (flash-attention style) accumulator so ft/elT need not be
    # fully VMEM-resident.
    out = pl.pallas_call(
        functools.partial(_attn_kernel, num_heads=num_heads,
                          out_feats=out_feats, alpha=alpha),
        grid=(n // tile_m,),
        in_specs=[
            pl.BlockSpec((tile_m, n), lambda i: (i, 0)),   # adj int8 dst tile
            pl.BlockSpec((hp, n), lambda i: (0, 0)),       # elT  (resident)
            pl.BlockSpec((tile_m, hp), lambda i: (i, 0)),  # er   dst tile
            pl.BlockSpec((n, hd), lambda i: (0, 0)),       # ft   (resident, bf16)
            pl.BlockSpec((tile_m, hd), lambda i: (i, 0)),  # res  dst tile
        ],
        out_specs=pl.BlockSpec((tile_m, hd), lambda i: (i, 0)),
        out_shape=jax.ShapeDtypeStruct((n, hd), jnp.float32),
        compiler_params=cparams,
    )(adj_i8, elt, er, ft_bf, res)
    return out


# ---------------------------------------------------------------------------
# Pure-JAX f32 reference reproducing GATConv(residual=True) + flatten.
# ---------------------------------------------------------------------------
def gat_layer_ref(feats, adj, w_fc, attn_l, attn_r, w_res, *,
                  num_heads, out_feats, alpha=0.2):
    n = feats.shape[0]
    ft = (feats @ w_fc).reshape(n, num_heads, out_feats)
    el = jnp.sum(ft * attn_l[None], axis=-1)           # (N, H)  src
    er = jnp.sum(ft * attn_r[None], axis=-1)           # (N, H)  dst
    e = el[None, :, :] + er[:, None, :]                 # (dst, src, H)
    e = jnp.where(e >= 0, e, alpha * e)
    e = jnp.where(adj[:, :, None] > 0, e, NEG_INF)
    m = jnp.max(e, axis=1, keepdims=True)
    p = jnp.exp(e - m) * adj[:, :, None]
    a = p / jnp.sum(p, axis=1, keepdims=True)
    rst = jnp.einsum('ijh,jhd->ihd', a, ft)
    rst = rst + (feats @ w_res).reshape(n, num_heads, out_feats)
    return rst.reshape(n, num_heads * out_feats)


if __name__ == "__main__":
    N, DIN, DOUT, H = 256, 32, 16, 4
    TM = 128
    ALPHA = 0.2

    key = jax.random.PRNGKey(0)
    k_feat, k_fc, k_al, k_ar, k_res = jax.random.split(key, 5)

    feats = jax.random.normal(k_feat, (N, DIN), dtype=jnp.float32)

    # Deterministic "xavier-normal-like" parameter init (synthetic weights).
    w_fc = 0.1 * jax.random.normal(k_fc, (DIN, H * DOUT), dtype=jnp.float32)
    attn_l = 0.1 * jax.random.normal(k_al, (H, DOUT), dtype=jnp.float32)
    attn_r = 0.1 * jax.random.normal(k_ar, (H, DOUT), dtype=jnp.float32)
    # residual=True and DIN != DOUT -> res_fc is a bias-free Linear(DIN, H*DOUT)
    w_res = 0.1 * jax.random.normal(k_res, (DIN, H * DOUT), dtype=jnp.float32)

    # Deterministic graph: ring with self loops + a skip edge, adj[dst, src].
    idx = jnp.arange(N)
    adj = jnp.zeros((N, N), dtype=jnp.float32)
    adj = adj.at[idx, idx].set(1.0)
    adj = adj.at[idx, (idx + 1) % N].set(1.0)
    adj = adj.at[idx, (idx - 1) % N].set(1.0)
    adj = adj.at[idx, (idx + 7) % N].set(1.0)

    out = gat_layer(feats, adj, w_fc, attn_l, attn_r, w_res,
                    num_heads=H, out_feats=DOUT, alpha=ALPHA, tile_m=TM)
    out = jax.block_until_ready(out)

    ref = gat_layer_ref(feats, adj, w_fc, attn_l, attn_r, w_res,
                        num_heads=H, out_feats=DOUT, alpha=ALPHA)

    assert out.shape == (N, H * DOUT)
    max_err = float(jnp.max(jnp.abs(out - ref)))
    # bf16 MXU operands + approx reciprocal vs pure-f32 reference.
    assert jnp.allclose(out, ref, atol=3e-2, rtol=3e-2), (
        f"mismatch vs reference (max abs err {max_err})")
    print("KERNEL_OK")
</pallas_src>

<mosaic_0001>
module attributes {stable_mosaic.version = 11 : i64} {
  func.func @_proj_kernel(%arg0: i32, %arg1: memref<128x32xbf16, #tpu.memory_space<vmem>>, %arg2: memref<32x128xbf16, #tpu.memory_space<vmem>>, %arg3: memref<8x64xf32, #tpu.memory_space<vmem>>, %arg4: memref<64x8xf32, #tpu.memory_space<vmem>>, %arg5: memref<128x64xbf16, #tpu.memory_space<vmem>>, %arg6: memref<128x64xf32, #tpu.memory_space<vmem>>, %arg7: memref<8x128xf32, #tpu.memory_space<vmem>>, %arg8: memref<128x8xf32, #tpu.memory_space<vmem>>) attributes {dimension_semantics = [#tpu.dimension_semantics<parallel>], iteration_bounds = array<i64: 2>, scalar_prefetch = 0 : i64, scratch_operands = 0 : i64, tpu.core_type = #tpu.core_type<tc>, window_params = [{transform_indices = @transform_0, window_bounds = array<i64: 128, 32>}, {pipeline_mode = #tpu.pipeline_mode<synchronous>, transform_indices = @transform_1, window_bounds = array<i64: 32, 128>}, {pipeline_mode = #tpu.pipeline_mode<synchronous>, transform_indices = @transform_2, window_bounds = array<i64: 8, 64>}, {pipeline_mode = #tpu.pipeline_mode<synchronous>, transform_indices = @transform_3, window_bounds = array<i64: 64, 8>}, {transform_indices = @transform_4, window_bounds = array<i64: 128, 64>}, {transform_indices = @transform_5, window_bounds = array<i64: 128, 64>}, {transform_indices = @transform_6, window_bounds = array<i64: 8, 128>}, {transform_indices = @transform_7, window_bounds = array<i64: 128, 8>}]} {
    %c0 = arith.constant 0 : index
    %c0_0 = arith.constant 0 : index
    %0 = vector.load %arg1[%c0, %c0_0] : memref<128x32xbf16, #tpu.memory_space<vmem>>, vector<128x32xbf16>
    %c0_1 = arith.constant 0 : index
    %c0_2 = arith.constant 0 : index
    %1 = vector.load %arg2[%c0_1, %c0_2] : memref<32x128xbf16, #tpu.memory_space<vmem>>, vector<32x128xbf16>
    %cst = arith.constant dense<0.000000e+00> : vector<128x128xf32>
    %2 = tpu.matmul %0, %1, %cst {dimension_numbers = #tpu.dot_dimension_numbers<[1], [0], [0], [1], [0, 0, 1, 1], [], []>} : vector<128x32xbf16>, vector<32x128xbf16>, vector<128x128xf32> -> vector<128x128xf32>
    %3 = vector.extract_strided_slice %2 {offsets = [0, 0], sizes = [128, 64], strides = [1, 1]} : vector<128x128xf32> to vector<128x64xf32>
    %4 = arith.truncf %3 : vector<128x64xf32> to vector<128x64xbf16>
    %c0_3 = arith.constant 0 : index
    %c0_4 = arith.constant 0 : index
    %5 = vector.load %arg5[%c0_3, %c0_4] : memref<128x64xbf16, #tpu.memory_space<vmem>>, vector<128x64xbf16>
    tpu.vector_store %arg5[%c0_3, %c0_4], %4 {strides = array<i32>} : memref<128x64xbf16, #tpu.memory_space<vmem>>, vector<128x64xbf16>,
    %6 = vector.extract_strided_slice %2 {offsets = [0, 64], sizes = [128, 64], strides = [1, 1]} : vector<128x128xf32> to vector<128x64xf32>
    %c0_5 = arith.constant 0 : index
    %c0_6 = arith.constant 0 : index
    %7 = vector.load %arg6[%c0_5, %c0_6] : memref<128x64xf32, #tpu.memory_space<vmem>>, vector<128x64xf32>
    tpu.vector_store %arg6[%c0_5, %c0_6], %6 {strides = array<i32>} : memref<128x64xf32, #tpu.memory_space<vmem>>, vector<128x64xf32>,
    %c0_7 = arith.constant 0 : index
    %c0_8 = arith.constant 0 : index
    %8 = vector.load %arg3[%c0_7, %c0_8] : memref<8x64xf32, #tpu.memory_space<vmem>>, vector<8x64xf32>
    %cst_9 = arith.constant dense<0.000000e+00> : vector<8x128xf32>
    %9 = tpu.matmul %8, %3, %cst_9 {dimension_numbers = #tpu.dot_dimension_numbers<[1], [1], [0], [0], [0, 0, 1, 0], [], []>} : vector<8x64xf32>, vector<128x64xf32>, vector<8x128xf32> -> vector<8x128xf32>
    %c0_10 = arith.constant 0 : index
    %c0_11 = arith.constant 0 : index
    %10 = vector.load %arg7[%c0_10, %c0_11] : memref<8x128xf32, #tpu.memory_space<vmem>>, vector<8x128xf32>
    tpu.vector_store %arg7[%c0_10, %c0_11], %9 {strides = array<i32>} : memref<8x128xf32, #tpu.memory_space<vmem>>, vector<8x128xf32>,
    %c0_12 = arith.constant 0 : index
    %c0_13 = arith.constant 0 : index
    %11 = vector.load %arg4[%c0_12, %c0_13] : memref<64x8xf32, #tpu.memory_space<vmem>>, vector<64x8xf32>
    %cst_14 = arith.constant dense<0.000000e+00> : vector<128x8xf32>
    %12 = tpu.matmul %3, %11, %cst_14 {dimension_numbers = #tpu.dot_dimension_numbers<[1], [0], [0], [1], [0, 0, 1, 1], [], []>} : vector<128x64xf32>, vector<64x8xf32>, vector<128x8xf32> -> vector<128x8xf32>
    %c0_15 = arith.constant 0 : index
    %c0_16 = arith.constant 0 : index
    %13 = vector.load %arg8[%c0_15, %c0_16] : memref<128x8xf32, #tpu.memory_space<vmem>>, vector<128x8xf32>
    tpu.vector_store %arg8[%c0_15, %c0_16], %12 {strides = array<i32>} : memref<128x8xf32, #tpu.memory_space<vmem>>, vector<128x8xf32>,
    return
  }
  func.func @transform_0(%arg0: i32) -> (i32, i32) {
    %c0_i32 = arith.constant 0 : i32
    %c0_i32_0 = arith.constant 0 : i32
    return %arg0, %c0_i32 : i32, i32
  }
  func.func @transform_1(%arg0: i32) -> (i32, i32) {
    %c0_i32 = arith.constant 0 : i32
    %c0_i32_0 = arith.constant 0 : i32
    %c0_i32_1 = arith.constant 0 : i32
    return %c0_i32, %c0_i32_0 : i32, i32
  }
  func.func @transform_2(%arg0: i32) -> (i32, i32) {
    %c0_i32 = arith.constant 0 : i32
    %c0_i32_0 = arith.constant 0 : i32
    %c0_i32_1 = arith.constant 0 : i32
    return %c0_i32, %c0_i32_0 : i32, i32
  }
  func.func @transform_3(%arg0: i32) -> (i32, i32) {
    %c0_i32 = arith.constant 0 : i32
    %c0_i32_0 = arith.constant 0 : i32
    %c0_i32_1 = arith.constant 0 : i32
    return %c0_i32, %c0_i32_0 : i32, i32
  }
  func.func @transform_4(%arg0: i32) -> (i32, i32) {
    %c0_i32 = arith.constant 0 : i32
    %c0_i32_0 = arith.constant 0 : i32
    return %arg0, %c0_i32 : i32, i32
  }
  func.func @transform_5(%arg0: i32) -> (i32, i32) {
    %c0_i32 = arith.constant 0 : i32
    %c0_i32_0 = arith.constant 0 : i32
    return %arg0, %c0_i32 : i32, i32
  }
  func.func @transform_6(%arg0: i32) -> (i32, i32) {
    %c0_i32 = arith.constant 0 : i32
    %c0_i32_0 = arith.constant 0 : i32
    return %c0_i32, %arg0 : i32, i32
  }
  func.func @transform_7(%arg0: i32) -> (i32, i32) {
    %c0_i32 = arith.constant 0 : i32
    %c0_i32_0 = arith.constant 0 : i32
    return %arg0, %c0_i32 : i32, i32
  }
}

</mosaic_0001>

<bundles_post_ra>
// kernel: tpu_custom_call.1
= control target key start
LH: loop header
LB: loop body
LE: loop exit
PB: predicated region body
PF: predicated region fallthrough
CT: control target
= control target key end

     0   :  { %13 = vsyncpa [#allocation3], 0  ;;  %s1924_s0 = inlined_call_operand.vmem [shape: bf16[256,32], index: 0, kind: input, shape index: {}]   ;;  %s1925_s1 = inlined_call_operand.vmem [shape: bf16[32,128], index: 1, kind: input, shape index: {}]   ;;  %s1926_s2 = inlined_call_operand.vmem [shape: f32[8,64], index: 2, kind: input, shape index: {}]   ;;  %s1927_s3 = inlined_call_operand.vmem [shape: f32[64,8], index: 3, kind: input, shape index: {}]   ;;  %s1928_s4 = inlined_call_operand.vmem [shape: bf16[256,64], index: 4, kind: output, shape index: {0}]   ;;  %s1929_s5 = inlined_call_operand.vmem [shape: f32[256,64], index: 5, kind: output, shape index: {1}]   ;;  %s1930_s6 = inlined_call_operand.hbm [shape: f32[8,256], index: 6, kind: output, shape index: {2}]   ;;  %s1931_s7 = inlined_call_operand.vmem [shape: f32[256,8], index: 7, kind: output, shape index: {3}]  }
   0x1   :  { %15 = vsyncpa [#allocation3 + $0x1], 0  ;;  %s1584_s24 = smov 0   ;;  %s1586_s25 = smov 0  }
   0x2   :  { %s1588_s26 = smov 0   ;;  %s1590_s27 = smov 0  }
   0x3 LB: > { %s1605_s28 = sadd.s32 4294967295, %s1537_s27   ;;  %s1128_s29 = sadd.s32 4294967294, %s1537_s27   ;;  %s1537_s27 = sphi %s1590_s27, %s1939_s27   ;;  %s1533_s26 = sphi %s1588_s26, %s1938_s26   ;;  %s1529_s25 = sphi %s1586_s25, %s1937_s25   ;;  %s1525_s24 = sphi %s1584_s24, %s1936_s24  }
   0x4   : > { %s1609_s30 = sadd.s32 1, %s1537_s27   ;;  %s169_s8 = sadd.s32 1, %s1533_s26 }
   0x5   : > { %s166_s9 = ssub.s32 %s1537_s27, %s1609_s30  ;;  %p179_p0 = scmp.ne.s32.totalorder %s1533_s26, %s1529_s25 }
   0x6   : > { %p167_p1 = scmp.eq.s32.totalorder %s166_s9, 0  ;;  %p180_p2 = scmp.eq.s32.totalorder %s1605_s28, 1 }
   0x7   : > { %p185_p3 = scmp.ne.s32.totalorder %s1529_s25, %s1525_s24  ;;  %p186_p4 = scmp.eq.s32.totalorder %s1128_s29, 1 }
   0x8   : > { %s1620_s10 = scalar_select %p167_p1, %s1533_s26, %s169_s8  }
   0x9   : > { %p1622_p5 = por %p180_p2, %p179_p0  ;;  %p1626_p6 = por %p186_p4, %p185_p3 }
   0xa   : > { %p1131_p7 = scmp.ge.s32.totalorder %s1537_s27, 1  ;;  %p248_p8 = scmp.lt.s32.totalorder %s1537_s27, 3 }
   0xc   : > { %p249_p9 = pnand %p1131_p7, %p248_p8 }
   0xd   : > { %v1465_v0 = vld [vmem:[%s1925_s1] sm:$0xff] (!%p249_p9)   ;;  %s1133_s15 = sshll.u32 (!%p249_p9), %s1605_s28, 4  ;;  %v1466_v1 = vld [vmem:[%s1925_s1 + $0x8] sm:$0xff] (!%p249_p9)   ;;  %v785_v5 = vld [vmem:[%s1927_s3 + $0x10] sm:$0xff] (!%p249_p9)  ;;  %vm392_vm0 = vcmask (!%p249_p9), 261120   ;;  %v1539_v22 = vmov (!%p249_p9), 0.0|0.0  }
   0xe   : > { %252 = sbr.rel (%p249_p9) target bundleno = 532 (0x214), region = 36  ;;  %p296_p10 = scmp.lt.s32.totalorder (!%p249_p9), %s1133_s15, 31  ;;  %1279 = vmatprep.subr.bf16.mxu0 (!%p249_p9), %v1465_v0  ;;  %v783_v2 = vld [vmem:[%s1927_s3] sm:$0xff] (!%p249_p9)  ;;  %v784_v3 = vld [vmem:[%s1927_s3 + $0x8] sm:$0xff] (!%p249_p9)  ;;  %v786_v6 = vld [vmem:[%s1927_s3 + $0x18] sm:$0xff] (!%p249_p9)  ;;  %1374 = vmatprep.subr.bf16.mxu1 (!%p249_p9), %v1539_v22  ;;  %vm1540_vm1 = vmmov (!%p249_p9), 0  }
   0xf   : > { %1280 = vmatpush3.bf16.msra.mxu0 (!%p249_p9), %v1465_v0  ;;  %v1406_v4 = vpack.c.bf16 (!%p249_p9), %v784_v3, %v783_v2  ;;  %v787_v8 = vld [vmem:[%s1927_s3 + $0x20] sm:$0xff] (!%p249_p9)  ;;  %v788_v9 = vld [vmem:[%s1927_s3 + $0x28] sm:$0xff] (!%p249_p9)  ;;  %v1410_v11 = vpack.c.bf16 (!%p249_p9), %v786_v6, %v785_v5  ;;  %v789_v19 = vld [vmem:[%s1927_s3 + $0x30] sm:$0xff] (!%p249_p9)  ;;  %v1541_v23 = vmov (!%p249_p9), 0.0   ;;  %vm659_vm2 = vcmask (!%p249_p9), 523264  }
  0x10   : > { %1281 = vmatprep.subr.bf16.mxu0 (!%p249_p9), %v1466_v1  ;;  %v1414_v13 = vpack.c.bf16 (!%p249_p9), %v788_v9, %v787_v8  ;;  %v790_v20 = vld [vmem:[%s1927_s3 + $0x38] sm:$0xff] (!%p249_p9)  ;;  %1331 = vmatprep.mubr.msk.f32.mxu1 (!%p249_p9), %vm1540_vm1, %v1541_v23  ;;  %vm578_vm3 = vcmask (!%p249_p9), 519168   ;;  %vm1694_vm4 = vmpackc.low (!%p249_p9), %vm659_vm2, %vm659_vm2  ;;  %vm936_vm5 = vcmask (!%p249_p9), 64512  }
  0x11   : > { %v1418_v21 = vpack.c.bf16 (!%p249_p9), %v790_v20, %v789_v19 }
  0x13   : > { %1282 = vmatpush3.bf16.msra.mxu0 (!%p249_p9), %v1466_v1  ;;  %v676_v1 = vld [vmem:[%s1926_s2] sm:$0xff] (!%p249_p9) }
  0x14   : > { %1407 = vmatprep.subr.bf16.mxu0 (!%p249_p9), %v1406_v4 }
  0x15   : > { %s1941_s15 = smov (!%p296_p10, %s1133_s15), 31 }
  0x16   : > { %s1134_s22 = sshll.u32 %s1941_s15, 2  ;;  %s1138_s18 = sshll.u32 %s1941_s15, 3 }
  0x17   : > { %s299_s16 = scalar_lea.vmem %s1924_s0, %s1134_s22  ;;  %s1685_s14 = scalar_lea.vmem %s1928_s4, %s1134_s22 }
  0x18   : > { %v1467_v7 = vld [vmem:[%s299_s16] sm:$0xff]   ;;  %v1468_v10 = vld [vmem:[%s299_s16 + $0x8] sm:$0xff]   ;;  %v1469_v12 = vld [vmem:[%s299_s16 + $0x10] sm:$0xff]   ;;  %s1804_s21 = scalar_lea.vmem %s1929_s5, %s1138_s18  ;;  %s1843_s8 = scalar_lea.vmem %s1931_s7, %s1138_s18 }
  0x19   : > { %1283 = vmatprep.mubr.msk.bf16.mxu0 %vm392_vm0, %v1467_v7  ;;  %v1470_v14 = vld [vmem:[%s299_s16 + $0x18] sm:$0xff]   ;;  %v1471_v15 = vld [vmem:[%s299_s16 + $0x20] sm:$0xff]   ;;  %v1472_v16 = vld [vmem:[%s299_s16 + $0x28] sm:$0xff]   ;;  %s285_s15 = sand.u32 1, %s1529_s25  }
  0x1a   : > { %1284 = vmatmul.mubr.msk.bf16.vlgmr.msra.gmra.mrb[0].mxu0 %vm392_vm0, %v1468_v10  ;;  %v1473_v17 = vld [vmem:[%s299_s16 + $0x30] sm:$0xff]   ;;  %v1474_v18 = vld [vmem:[%s299_s16 + $0x38] sm:$0xff]   ;;  %s1542_s16 = smov 64   ;;  %s1132_s9 = sshll.u32 %s285_s15, 3 }
  0x1b   : > { %1287 = vmatprep.mubr.msk.bf16.mxu0 %vm392_vm0, %v1469_v12  ;;  %1409 = vmatpush3.bf16.msra.mxu0 %v1406_v4  ;;  %s287_s13 = scalar_lea.vmem [#allocation2], %s1132_s9  ;;  %s964_s19 = scalar_lea.sflag [#allocation3], %s285_s15 }
  0x1c   : > { %1411 = vmatprep.subr.bf16.mxu0 %v1410_v11 }
  0x1f   : > { %1413 = vmatpush3.bf16.msra.mxu0 %v1410_v11 }
  0x20   : > { %1415 = vmatprep.subr.bf16.mxu0 %v1414_v13 }
  0x22   : > { %1288 = vmatmul.mubr.msk.bf16.gmra.mrb[4].mxu0 %vm392_vm0, %v1470_v14 }
  0x23   : > { %1291 = vmatprep.mubr.msk.bf16.mxu0 %vm392_vm0, %v1471_v15  ;;  %1417 = vmatpush3.bf16.msra.mxu0 %v1414_v13 }
  0x24   : > { %1419 = vmatprep.subr.bf16.mxu0 %v1418_v21 }
  0x27   : > { %1421 = vmatpush3.bf16.msra.mxu0 %v1418_v21 }
  0x2a   : > { %1292 = vmatmul.mubr.msk.bf16.gmra.mrb[8].mxu0 %vm392_vm0, %v1472_v16 }
  0x2b   : > { %1295 = vmatprep.mubr.msk.bf16.mxu0 %vm392_vm0, %v1473_v17 }
  0x32   : > { %1296 = vmatmul.mubr.msk.bf16.gmra.mrb[12].mxu0 %vm392_vm0, %v1474_v18 }
  0xed   : > { %v1285_v24 = vpop.f32.mrb[0].mxu0 }
  0xee   : > { %v1214_v25 = vpack.c.bf16 %v1285_v24, %v1285_v24  ;;  %615 = vrot.lane.b32.xlu1 %v1285_v24, %s1542_s16  ;;  %v451_v26 = vpop.f32.mrb[1].mxu0 }
  0xef   : > { %v1212_v27 = vpack.c.bf16 %v451_v26, %v451_v26  ;;  %611 = vrot.lane.b32.xlu0 %v451_v26, %s1542_s16  ;;  %v1286_v28 = vpop.f32.mrb[2].mxu0  ;;  %1350 = vmatprep.mubr.msk.f32.mxu0 %vm659_vm2, %v451_v26 }
  0xf0   : > { %581 = vst.msk [vmem:[%s1685_s14 + $0x8] sm:$0xf] %vm578_vm3, %v1214_v25  ;;  %v1215_v29 = vpack.c.bf16 %v1286_v28, %v1286_v28  ;;  %v1379_v30 = vpack.c.bf16 %v1286_v28, %v1285_v24  ;;  %v454_v31 = vpop.f32.mrb[3].mxu0 }
  0xf1   : > { %579 = vst.msk [vmem:[%s1685_s14] sm:$0xf] %vm578_vm3, %v1212_v27  ;;  %v1213_v33 = vpack.c.bf16 %v454_v31, %v454_v31  ;;  %1351 = vmatmul.mubr.msk.f32.vlgmr.msra.gmra.mrb[16].mxu0 %vm659_vm2, %v454_v31  ;;  %v1375_v34 = vpack.c.bf16 %v454_v31, %v451_v26 }
  0xf2   : > { %582 = vst.msk [vmem:[%s1685_s14 + $0xc] sm:$0xf] %vm578_vm3, %v1215_v29  ;;  %617 = vrot.lane.b32.xlu1 %v1286_v28, %s1542_s16  ;;  %1353 = vmatprep.mubr.msk.f32.mxu0 %vm659_vm2, %v1285_v24 }
  0xf3   : > { %580 = vst.msk [vmem:[%s1685_s14 + $0x4] sm:$0xf] %vm578_vm3, %v1213_v33  ;;  %613 = vrot.lane.b32.xlu0 %v454_v31, %s1542_s16  ;;  %1377 = vmatpush3.bf16.xpose.msk.msra.mxu1 %vm1694_vm4, %v1375_v34 }
  0xf4   : > { %1378 = vmatprep.subr.bf16.mxu1 %v1539_v22 }
  0xf5   : > { %v1711_v35 = vpop.f32.mrb[4].mxu0  ;;  %1354 = vmatmul.mubr.msk.f32.gmra.mrb[18].mxu0 %vm659_vm2, %v1286_v28 }
  0xf6   : > { %v1218_v36 = vpack.c.bf16 %v1711_v35, %v1711_v35  ;;  %v467_v37 = vpop.f32.mrb[5].mxu0 }
  0xf7   : > { %v1216_v38 = vpack.c.bf16 %v467_v37, %v467_v37  ;;  %v1716_v39 = vpop.f32.mrb[6].mxu0  ;;  %1356 = vmatprep.mubr.msk.f32.mxu0 %vm659_vm2, %v467_v37  ;;  %623 = vrot.lane.b32.xlu0 %v1711_v35, %s1542_s16 }
  0xf8   : > { %585 = vst.msk [vmem:[%s1685_s14 + $0x18] sm:$0xf] %vm578_vm3, %v1218_v36  ;;  %v1219_v40 = vpack.c.bf16 %v1716_v39, %v1716_v39  ;;  %v1387_v41 = vpack.c.bf16 %v1716_v39, %v1711_v35  ;;  %v470_v42 = vpop.f32.mrb[7].mxu0  ;;  %625 = vrot.lane.b32.xlu1 %v1716_v39, %s1542_s16 }
  0xf9   : > { %583 = vst.msk [vmem:[%s1685_s14 + $0x10] sm:$0xf] %vm578_vm3, %v1216_v38  ;;  %v1217_v43 = vpack.c.bf16 %v470_v42, %v470_v42  ;;  %v1383_v44 = vpack.c.bf16 %v470_v42, %v467_v37  ;;  %1357 = vmatmul.mubr.msk.f32.gmra.mrb[20].mxu0 %vm659_vm2, %v470_v42 }
  0xfa   : > { %586 = vst.msk [vmem:[%s1685_s14 + $0x1c] sm:$0xf] %vm578_vm3, %v1219_v40  ;;  %1359 = vmatprep.mubr.msk.f32.mxu0 %vm659_vm2, %v1711_v35 }
  0xfb   : > { %584 = vst.msk [vmem:[%s1685_s14 + $0x14] sm:$0xf] %vm578_vm3, %v1217_v43  ;;  %1381 = vmatpush3.bf16.xpose.msk.msra.mxu1 %vm1694_vm4, %v1379_v30  ;;  %619 = vrot.lane.b32.xlu0 %v467_v37, %s1542_s16 }
  0xfc   : > { %621 = vrot.lane.b32.xlu1 %v470_v42, %s1542_s16  ;;  %1382 = vmatprep.subr.bf16.mxu1 %v1539_v22 }
  0xfd   : > { %1360 = vmatmul.mubr.msk.f32.gmra.mrb[22].mxu0 %vm659_vm2, %v1716_v39  ;;  %v1293_v45 = vpop.f32.mrb[8].mxu0 }
  0xfe   : > { %v1222_v46 = vpack.c.bf16 %v1293_v45, %v1293_v45  ;;  %v483_v47 = vpop.f32.mrb[9].mxu0 }
  0xff   : > { %v1220_v48 = vpack.c.bf16 %v483_v47, %v483_v47  ;;  %v1294_v49 = vpop.f32.mrb[10].mxu0  ;;  %1362 = vmatprep.mubr.msk.f32.mxu0 %vm659_vm2, %v483_v47  ;;  %631 = vrot.lane.b32.xlu0 %v1293_v45, %s1542_s16 }
 0x100   : > { %589 = vst.msk [vmem:[%s1685_s14 + $0x28] sm:$0xf] %vm578_vm3, %v1222_v46  ;;  %v1223_v50 = vpack.c.bf16 %v1294_v49, %v1294_v49  ;;  %v1395_v51 = vpack.c.bf16 %v1294_v49, %v1293_v45  ;;  %v486_v52 = vpop.f32.mrb[11].mxu0  ;;  %633 = vrot.lane.b32.xlu1 %v1294_v49, %s1542_s16 }
 0x101   : > { %587 = vst.msk [vmem:[%s1685_s14 + $0x20] sm:$0xf] %vm578_vm3, %v1220_v48  ;;  %v1221_v53 = vpack.c.bf16 %v486_v52, %v486_v52  ;;  %v1391_v54 = vpack.c.bf16 %v486_v52, %v483_v47  ;;  %1363 = vmatmul.mubr.msk.f32.gmra.mrb[24].mxu0 %vm659_vm2, %v486_v52 }
 0x102   : > { %590 = vst.msk [vmem:[%s1685_s14 + $0x2c] sm:$0xf] %vm578_vm3, %v1223_v50  ;;  %1365 = vmatprep.mubr.msk.f32.mxu0 %vm659_vm2, %v1293_v45 }
 0x103   : > { %1385 = vmatpush3.bf16.xpose.msk.msra.mxu1 %vm1694_vm4, %v1383_v44  ;;  %588 = vst.msk [vmem:[%s1685_s14 + $0x24] sm:$0xf] %vm578_vm3, %v1221_v53  ;;  %627 = vrot.lane.b32.xlu0 %v483_v47, %s1542_s16 }
 0x104   : > { %1386 = vmatprep.subr.bf16.mxu1 %v1539_v22  ;;  %629 = vrot.lane.b32.xlu1 %v486_v52, %s1542_s16 }
 0x105   : > { %1366 = vmatmul.mubr.msk.f32.gmra.mrb[26].mxu0 %vm659_vm2, %v1294_v49  ;;  %v1297_v55 = vpop.f32.mrb[12].mxu0 }
 0x106   : > { %v1226_v56 = vpack.c.bf16 %v1297_v55, %v1297_v55  ;;  %v499_v57 = vpop.f32.mrb[13].mxu0 }
 0x107   : > { %v1224_v58 = vpack.c.bf16 %v499_v57, %v499_v57  ;;  %v1298_v59 = vpop.f32.mrb[14].mxu0  ;;  %1368 = vmatprep.mubr.msk.f32.mxu0 %vm659_vm2, %v499_v57  ;;  %635 = vrot.lane.b32.xlu0 %v499_v57, %s1542_s16 }
 0x108   : > { %593 = vst.msk [vmem:[%s1685_s14 + $0x38] sm:$0xf] %vm578_vm3, %v1226_v56  ;;  %v1227_v60 = vpack.c.bf16 %v1298_v59, %v1298_v59  ;;  %v1403_v61 = vpack.c.bf16 %v1298_v59, %v1297_v55  ;;  %v502_v62 = vpop.f32.mrb[15].mxu0 }
 0x109   : > { %591 = vst.msk [vmem:[%s1685_s14 + $0x30] sm:$0xf] %vm578_vm3, %v1224_v58  ;;  %v1225_v63 = vpack.c.bf16 %v502_v62, %v502_v62  ;;  %v1399_v0 = vpack.c.bf16 %v502_v62, %v499_v57  ;;  %1369 = vmatmul.mubr.msk.f32.gmra.mrb[28].mxu0 %vm659_vm2, %v502_v62  ;;  %637 = vrot.lane.b32.xlu1 %v502_v62, %s1542_s16 }
 0x10a   : > { %594 = vst.msk [vmem:[%s1685_s14 + $0x3c] sm:$0xf] %vm578_vm3, %v1227_v60  ;;  %1371 = vmatprep.mubr.msk.f32.mxu0 %vm659_vm2, %v1297_v55 }
 0x10b   : > { %1389 = vmatpush3.bf16.xpose.msk.msra.mxu1 %vm1694_vm4, %v1387_v41  ;;  %592 = vst.msk [vmem:[%s1685_s14 + $0x34] sm:$0xf] %vm578_vm3, %v1225_v63  ;;  %639 = vrot.lane.b32.xlu0 %v1297_v55, %s1542_s16  ;;  %s990_s14 = sshll.u32 %s287_s13, 4  ;;  %s1879_s14 = int_to_ptr.vmem [resolvable:$true] %s990_s14 }
 0x10c   : > { %1390 = vmatprep.subr.bf16.mxu1 %v1539_v22  ;;  %s1475_s20 = scalar_lea.vmem %s1879_s14, 128 }
 0x10d   : > { %1372 = vmatmul.mubr.msk.f32.gmra.mrb[30].mxu0 %vm659_vm2, %v1298_v59  ;;  %641 = vrot.lane.b32.xlu1 %v1298_v59, %s1542_s16  ;;  %s1209_s16 = sshll.u32 %s1605_s28, 7  ;;  %p1476_p11 = scmp.ne.s32.totalorder %s1879_s14, %s1475_s20 }
 0x10e   : > { %s1884_s18 = scalar_lea.hbm %s1930_s6, %s1209_s16  ;;  %s1543_s28 = smov [#allocation2]  }
 0x10f   : > { %p1477_p12 = pnand %p1476_p11, %p1622_p5 }
 0x111   : > { %p1478_p13 = pneg %p1477_p12 }
 0x113   : > { %1393 = vmatpush3.bf16.xpose.msk.msra.mxu1 %vm1694_vm4, %v1391_v54 }
 0x114   : > { %1394 = vmatprep.subr.bf16.mxu1 %v1539_v22 }
 0x11b   : > { %1397 = vmatpush3.bf16.xpose.msk.msra.mxu1 %vm1694_vm4, %v1395_v51 }
 0x11c   : > { %1398 = vmatprep.subr.bf16.mxu1 %v1539_v22 }
 0x123   : > { %1401 = vmatpush3.bf16.xpose.msk.msra.mxu1 %vm1694_vm4, %v1399_v0 }
 0x124   : > { %1402 = vmatprep.subr.bf16.mxu1 %v1539_v22 }
 0x12b   : > { %1405 = vmatpush3.bf16.xpose.msk.msra.mxu1 %vm1694_vm4, %v1403_v61 }
 0x132   : > { %1332 = vmatmul.mubr.msk.f32.vlgmr.msra.gmra.mrb[0].mxu1 %vm659_vm2, %v676_v1 }
 0x160   : > { %v616_v2 = vpop.permute.xlu1 %615 }
 0x161   : > { %662 = vst.msk [vmem:[%s1804_s21 + $0x10] sm:$0xff] %vm659_vm2, %v616_v2  ;;  %v612_v3 = vpop.permute.xlu0 %611 }
 0x162   : > { %660 = vst.msk [vmem:[%s1804_s21] sm:$0xff] %vm659_vm2, %v612_v3 }
 0x164   : > { %v618_v4 = vpop.permute.xlu1 %617 }
 0x165   : > { %663 = vst.msk [vmem:[%s1804_s21 + $0x18] sm:$0xff] %vm659_vm2, %v618_v4  ;;  %v614_v5 = vpop.permute.xlu0 %613 }
 0x166   : > { %661 = vst.msk [vmem:[%s1804_s21 + $0x8] sm:$0xff] %vm659_vm2, %v614_v5 }
 0x169   : > { %v624_v6 = vpop.permute.xlu0 %623 }
 0x16a   : > { %666 = vst.msk [vmem:[%s1804_s21 + $0x30] sm:$0xff] %vm659_vm2, %v624_v6  ;;  %v626_v7 = vpop.permute.xlu1 %625 }
 0x16b   : > { %667 = vst.msk [vmem:[%s1804_s21 + $0x38] sm:$0xff] %vm659_vm2, %v626_v7 }
 0x16d   : > { %v620_v8 = vpop.permute.xlu0 %619 }
 0x16e   : > { %664 = vst.msk [vmem:[%s1804_s21 + $0x20] sm:$0xff] %vm659_vm2, %v620_v8  ;;  %v622_v9 = vpop.permute.xlu1 %621 }
 0x16f   : > { %665 = vst.msk [vmem:[%s1804_s21 + $0x28] sm:$0xff] %vm659_vm2, %v622_v9 }
 0x171   : > { %v632_v10 = vpop.permute.xlu0 %631 }
 0x172   : > { %670 = vst.msk [vmem:[%s1804_s21 + $0x50] sm:$0xff] %vm659_vm2, %v632_v10  ;;  %v634_v11 = vpop.permute.xlu1 %633 }
 0x173   : > { %671 = vst.msk [vmem:[%s1804_s21 + $0x58] sm:$0xff] %vm659_vm2, %v634_v11 }
 0x175   : > { %v628_v12 = vpop.permute.xlu0 %627 }
 0x176   : > { %668 = vst.msk [vmem:[%s1804_s21 + $0x40] sm:$0xff] %vm659_vm2, %v628_v12  ;;  %v630_v13 = vpop.permute.xlu1 %629 }
 0x177   : > { %669 = vst.msk [vmem:[%s1804_s21 + $0x48] sm:$0xff] %vm659_vm2, %v630_v13 }
 0x179   : > { %v636_v14 = vpop.permute.xlu0 %635 }
 0x17a   : > { %672 = vst.msk [vmem:[%s1804_s21 + $0x60] sm:$0xff] %vm659_vm2, %v636_v14 }
 0x17b   : > { %v638_v15 = vpop.permute.xlu1 %637 }
 0x17c   : > { %673 = vst.msk [vmem:[%s1804_s21 + $0x68] sm:$0xff] %vm659_vm2, %v638_v15 }
 0x17d   : > { %v640_v16 = vpop.permute.xlu0 %639 }
 0x17e   : > { %674 = vst.msk [vmem:[%s1804_s21 + $0x70] sm:$0xff] %vm659_vm2, %v640_v16 }
 0x17f   : > { %v642_v17 = vpop.permute.xlu1 %641 }
 0x180   : > { %675 = vst.msk [vmem:[%s1804_s21 + $0x78] sm:$0xff] %vm659_vm2, %v642_v17  ;;  %s1479_s21 = sshll.u32 %s1543_s28, 4  ;;  %s1480_s21 = int_to_ptr.vmem [resolvable:$false] %s1479_s21 }
 0x181   : > { %s1481_s23 = scalar_lea.vmem %s1480_s21, 256  ;;  %p1482_p0 = scmp.lt.s32.totalorder %s1879_s14, %s1480_s21 }
 0x182   : > { %p1483_p1 = scmp.lt.s32.totalorder %s1481_s23, %s1475_s20 }
 0x184   : > { %p1484_p2 = por %p1483_p1, %p1482_p0 }
 0x186   : > { %p1485_p3 = pnand %p1484_p2, %p1478_p13 }
 0x1c4   : > { %v1352_v18 = vpop.f32.mrb[16].mxu0 }
 0x1c5   : > { %938 = vst.msk [vmem:[%s1843_s8 + $0x8] sm:$0xff] %vm936_vm5, %v1352_v18  ;;  %v857_v19 = vpop.f32.mrb[17].mxu0 }
 0x1c6   : > { %937 = vst.msk [vmem:[%s1843_s8] sm:$0xff] %vm936_vm5, %v857_v19 }
 0x1c8   : > { %v1355_v20 = vpop.f32.mrb[18].mxu0 }
 0x1c9   : > { %940 = vst.msk [vmem:[%s1843_s8 + $0x18] sm:$0xff] %vm936_vm5, %v1355_v20  ;;  %v867_v21 = vpop.f32.mrb[19].mxu0 }
 0x1ca   : > { %939 = vst.msk [vmem:[%s1843_s8 + $0x10] sm:$0xff] %vm936_vm5, %v867_v21 }
 0x1cc   : > { %v1358_v22 = vpop.f32.mrb[20].mxu0 }
 0x1cd   : > { %942 = vst.msk [vmem:[%s1843_s8 + $0x28] sm:$0xff] %vm936_vm5, %v1358_v22  ;;  %v877_v23 = vpop.f32.mrb[21].mxu0 }
 0x1ce   : > { %941 = vst.msk [vmem:[%s1843_s8 + $0x20] sm:$0xff] %vm936_vm5, %v877_v23 }
 0x1d0   : > { %v1361_v24 = vpop.f32.mrb[22].mxu0 }
 0x1d1   : > { %944 = vst.msk [vmem:[%s1843_s8 + $0x38] sm:$0xff] %vm936_vm5, %v1361_v24  ;;  %v887_v25 = vpop.f32.mrb[23].mxu0 }
 0x1d2   : > { %943 = vst.msk [vmem:[%s1843_s8 + $0x30] sm:$0xff] %vm936_vm5, %v887_v25 }
 0x1d4   : > { %v1364_v26 = vpop.f32.mrb[24].mxu0 }
 0x1d5   : > { %946 = vst.msk [vmem:[%s1843_s8 + $0x48] sm:$0xff] %vm936_vm5, %v1364_v26  ;;  %v897_v27 = vpop.f32.mrb[25].mxu0 }
 0x1d6   : > { %945 = vst.msk [vmem:[%s1843_s8 + $0x40] sm:$0xff] %vm936_vm5, %v897_v27 }
 0x1d8   : > { %v1367_v28 = vpop.f32.mrb[26].mxu0 }
 0x1d9   : > { %948 = vst.msk [vmem:[%s1843_s8 + $0x58] sm:$0xff] %vm936_vm5, %v1367_v28  ;;  %v907_v29 = vpop.f32.mrb[27].mxu0 }
 0x1da   : > { %947 = vst.msk [vmem:[%s1843_s8 + $0x50] sm:$0xff] %vm936_vm5, %v907_v29 }
 0x1dc   : > { %v1370_v30 = vpop.f32.mrb[28].mxu0 }
 0x1dd   : > { %950 = vst.msk [vmem:[%s1843_s8 + $0x68] sm:$0xff] %vm936_vm5, %v1370_v30  ;;  %v917_v31 = vpop.f32.mrb[29].mxu0 }
 0x1de   : > { %949 = vst.msk [vmem:[%s1843_s8 + $0x60] sm:$0xff] %vm936_vm5, %v917_v31 }
 0x1e0   : > { %v1373_v32 = vpop.f32.mrb[30].mxu0 }
 0x1e1   : > { %952 = vst.msk [vmem:[%s1843_s8 + $0x78] sm:$0xff] %vm936_vm5, %v1373_v32  ;;  %v927_v33 = vpop.f32.mrb[31].mxu0 }
 0x1e2   : > { %951 = vst.msk [vmem:[%s1843_s8 + $0x70] sm:$0xff] %vm936_vm5, %v927_v33 }
 0x205   : > { %v778_v34 = vpop.f32.mrb[0].mxu1 }
 0x206   : > { %782 = vst [vmem:[%s287_s13] sm:$0xff] %v778_v34  ;;  %v1333_v35 = vpop.f32.mrb[1].mxu1 }
 0x207   : > { %1488 = shalt.err (!%p1485_p3)
}
 0x208   : > { %s1489_s29 = scalar_lea.hbm %s1884_s18, 128  ;;  %s1493_s9 = scalar_lea.hbm %s1930_s6, 256 }
 0x209   : > { %p1490_p4 = scmp.ne.s32.totalorder %s1884_s18, %s1489_s29  ;;  %p1494_p9 = scmp.lt.u32.totalorder %s1884_s18, %s1930_s6 }
 0x20a   : > { %p1495_p10 = scmp.lt.u32.totalorder %s1493_s9, %s1489_s29  ;;  %p1497_p12 = scmp.lt.u32.totalorder %s1489_s29, %s1884_s18 }
 0x20b   : > { %p1491_p7 = pnand %p1490_p4, %p1622_p5 }
 0x20c   : > { %p1496_p11 = por %p1495_p10, %p1494_p9 }
 0x20d   : > { %p1492_p8 = pneg %p1491_p7 }
 0x20e   : > { %p1498_p13 = por %p1497_p12, %p1496_p11 }
 0x210   : > { %p1499_p0 = pnand %p1498_p13, %p1492_p8 }
 0x212   : > { %1502 = shalt.err (!%p1499_p0)
}
 0x213   : > { %1422 = dma.vmem_to_hbm [thread:$0]  (%p1622_p5), %s1879_s14, 128, %s1884_s18, %s964_s19  }
 0x214 PF: > { %p1428_p1 = scmp.ge.s32.totalorder %s1537_s27, 2  ;;  %s1022_s22 = sand.u32 1, %s1525_s24  }
 0x215   : > { %s1023_s17 = scalar_lea.sflag [#allocation3], %s1022_s22 }
 0x216   : > { %p1425_p2 = pnand %p1428_p1, %p1626_p6 }
 0x218   : > { %1520 = dma.done.wait (!%p1425_p2), %s1023_s17, 128  }
 0x219   : > { %1522 = vsyncadd (!%p1425_p2), %s1023_s17, 4294967168  ;;  %p18_p3 = scmp.ge.s32.totalorder %s1609_s30, 4   ;;  %s1936_s24 = smov %s1529_s25 }
 0x21a   : > { %s1937_s25 = smov %s1533_s26  ;;  %s1938_s26 = smov %s1620_s10 }
 0x21b   : > { %s1939_s27 = smov %s1609_s30  ;;  %20 = sbr.rel (!%p18_p3) target bundleno = 3 (0x3), region = 107 }
 0x222   :  { %1036 = vsyncpa [#allocation3], 1 }
 0x223   :  { %1038 = vsyncpa [#allocation3 + $0x1], 1 }

</bundles_post_ra>
